<compile_context>
chip_gen: v5e
topology: v5e:2x2
jax: 0.10.0
libtpu: 0.0.40
codegen_flags: <defaults>
</compile_context>

<pallas_src>
import functools

import jax
import jax.numpy as jnp
from jax.experimental import pallas as pl
from jax.experimental.pallas import tpu as pltpu


def _label_smoothing_kernel(logits_ref, target_ref, out_ref,
                            m_acc, se_acc, sx_acc, xt_acc, *,
                            confidence, smoothing, num_classes,
                            class_block, mask_class_tail):
    """Grid = (batch tiles, class tiles); class axis is an online reduction."""
    j = pl.program_id(1)
    n_c = pl.num_programs(1)

    @pl.when(j == 0)
    def _init():
        m_acc[...] = jnp.full(m_acc.shape, -jnp.inf, dtype=jnp.float32)
        se_acc[...] = jnp.zeros(se_acc.shape, dtype=jnp.float32)
        sx_acc[...] = jnp.zeros(sx_acc.shape, dtype=jnp.float32)
        xt_acc[...] = jnp.zeros(xt_acc.shape, dtype=jnp.float32)

    x = logits_ref[...]                                  # (tb, tc), native dtype
    tb, tc = x.shape

    # Class ids of this chunk as a (1, tc) row — broadcast inside the compares
    # (cheaper than a (tb, tc) iota on the VPU).
    cls = jax.lax.broadcasted_iota(jnp.int32, (1, tc), 1) + j * class_block

    if mask_class_tail:
        # Only traced when C % tc != 0: neutralize garbage tail columns.
        valid = cls < num_classes
        x_max_in = jnp.where(valid, x, -jnp.inf)
        x_sum_in = jnp.where(valid, x, 0)
    else:
        x_max_in = x
        x_sum_in = x

    # --- online logsumexp update (f32 accumulators; exp stays in f32 / EUP) ---
    m_chunk = jnp.max(x_max_in, axis=-1, keepdims=True).astype(jnp.float32)
    m_new = jnp.maximum(m_acc[...], m_chunk)
    se_acc[...] = (se_acc[...] * jnp.exp(m_acc[...] - m_new)
                   + jnp.sum(jnp.exp(x_max_in.astype(jnp.float32) - m_new),
                             axis=-1, keepdims=True))
    m_acc[...] = m_new

    # --- sum of logits and the target logit (native-dtype compare, f32 accum) ---
    sx_acc[...] += jnp.sum(x_sum_in, axis=-1, keepdims=True, dtype=jnp.float32)
    tgt = target_ref[...]                                # (tb, 1) int32
    xt_acc[...] += jnp.sum(jnp.where(cls == tgt, x, 0),
                           axis=-1, keepdims=True, dtype=jnp.float32)

    @pl.when(j == n_c - 1)
    def _finalize():
        lse = m_acc[...] + jnp.log(se_acc[...])          # per-row logsumexp
        nll_loss = lse - xt_acc[...]                     # -logprobs[target]
        smooth_loss = lse - sx_acc[...] * (1.0 / num_classes)   # -mean(logprobs)
        out_ref[...] = confidence * nll_loss + smoothing * smooth_loss


def _round_down(x, m):
    return (x // m) * m


def label_smoothing_loss(logits, target, num_classes, smoothing=0.1, *,
                         target_block_bytes=2 * 1024 * 1024,
                         vmem_limit_bytes=32 * 1024 * 1024):
    """logits: [B, num_classes], target: [B] int. Returns scalar f32 loss."""
    B, C = logits.shape
    assert C == num_classes
    confidence = 1.0 - smoothing
    dtype_bytes = jnp.dtype(logits.dtype).itemsize
    row_bytes = C * dtype_bytes

    # --- VMEM-budget-driven tile sizing -------------------------------------
    rows_fit = target_block_bytes // row_bytes           # rows per ~2 MiB block
    if rows_fit >= 8:
        # Whole class axis fits the budget: one class tile, big batch tile.
        tc = C
        tb = B if B <= rows_fit else max(8, _round_down(min(rows_fit, 2048), 8))
    else:
        # Vocab-scale C: tile the class axis; online LSE keeps VMEM bounded
        # independent of C (important for v7x's 64 MiB VMEM).
        tb = min(B, 8)
        tc = max(128, _round_down(target_block_bytes // (8 * dtype_bytes), 128))
        tc = min(tc, C)
    n_b = pl.cdiv(B, tb)
    n_c = pl.cdiv(C, tc)
    mask_class_tail = (n_c > 1) and (C % tc != 0)

    # v7x megacore: give the "parallel" batch axis at least 2 steps when possible.
    if n_b == 1 and B >= 16:
        tb = max(8, ((B + 15) // 16) * 8)
        n_b = pl.cdiv(B, tb)

    target2d = target.astype(jnp.int32).reshape(B, 1)

    kernel = functools.partial(
        _label_smoothing_kernel,
        confidence=confidence, smoothing=smoothing, num_classes=num_classes,
        class_block=tc, mask_class_tail=mask_class_tail)

    # Ragged tails (B % tb != 0 or C % tc != 0) need no host-side pad copy:
    # garbage stays inside its own (discarded) rows / masked columns, and Pallas
    # drops out-of-bounds output writes.
    per_row = pl.pallas_call(
        kernel,
        out_shape=jax.ShapeDtypeStruct((B, 1), jnp.float32),
        grid=(n_b, n_c),
        in_specs=[
            pl.BlockSpec((tb, tc), lambda i, j: (i, j)),
            pl.BlockSpec((tb, 1), lambda i, j: (i, 0)),
        ],
        out_specs=pl.BlockSpec((tb, 1), lambda i, j: (i, 0)),
        scratch_shapes=[pltpu.VMEM((tb, 1), jnp.float32)] * 4,
        compiler_params=pltpu.CompilerParams(
            dimension_semantics=("parallel", "arbitrary"),
            vmem_limit_bytes=vmem_limit_bytes,
        ),
    )(logits, target2d)

    # TODO(synk): an in-kernel masked partial-sum with a lane-dense output would
    # also delete this (tiny) XLA mean; kept (tb, 1) per-row output for
    # block-shape safety.
    return jnp.mean(per_row)


def _reference(logits, target, smoothing=0.1):
    confidence = 1.0 - smoothing
    logprobs = jax.nn.log_softmax(logits.astype(jnp.float32), axis=-1)
    nll = -jnp.take_along_axis(logprobs, target[:, None], axis=-1)[:, 0]
    smooth = -jnp.mean(logprobs, axis=-1)
    return jnp.mean(confidence * nll + smoothing * smooth)


if __name__ == "__main__":
    num_classes = 16
    smoothing = 0.1
    key = jax.random.PRNGKey(0)

    # Primary check: shapes implied by the module (logits [B, C], labels [B]).
    batch = 8
    k1, k2 = jax.random.split(key)
    logits = jax.random.normal(k1, (batch, num_classes), dtype=jnp.float32)
    target = jax.random.randint(k2, (batch,), 0, num_classes, dtype=jnp.int32)
    loss = jax.block_until_ready(
        label_smoothing_loss(logits, target, num_classes, smoothing))
    ref = _reference(logits, target, smoothing)
    assert jnp.allclose(loss, ref, atol=1e-5, rtol=1e-5), (loss, ref)

    # Secondary check: ragged batch (B % tb != 0) exercises the no-pad tail path.
    batch2 = 20
    k3, k4 = jax.random.split(k2)
    logits2 = jax.random.normal(k3, (batch2, num_classes), dtype=jnp.float32)
    target2 = jax.random.randint(k4, (batch2,), 0, num_classes, dtype=jnp.int32)
    loss2 = jax.block_until_ready(
        label_smoothing_loss(logits2, target2, num_classes, smoothing))
    ref2 = _reference(logits2, target2, smoothing)
    assert jnp.allclose(loss2, ref2, atol=1e-5, rtol=1e-5), (loss2, ref2)

    print("KERNEL_OK")
</pallas_src>

<mosaic_0001>
module attributes {stable_mosaic.version = 11 : i64} {
  func.func @_label_smoothing_kernel(%arg0: i32, %arg1: i32, %arg2: memref<8x16xf32, #tpu.memory_space<vmem>>, %arg3: memref<8x1xi32, #tpu.memory_space<vmem>>, %arg4: memref<8x1xf32, #tpu.memory_space<vmem>>, %arg5: memref<8x1xf32, #tpu.memory_space<vmem>>, %arg6: memref<8x1xf32, #tpu.memory_space<vmem>>, %arg7: memref<8x1xf32, #tpu.memory_space<vmem>>, %arg8: memref<8x1xf32, #tpu.memory_space<vmem>>) attributes {dimension_semantics = [#tpu.dimension_semantics<parallel>, #tpu.dimension_semantics<arbitrary>], iteration_bounds = array<i64: 1, 1>, scalar_prefetch = 0 : i64, scratch_operands = 4 : i64, tpu.core_type = #tpu.core_type<tc>, window_params = [{transform_indices = @transform_0, window_bounds = array<i64: 8, 16>}, {transform_indices = @transform_1, window_bounds = array<i64: 8, 1>}, {transform_indices = @transform_2, window_bounds = array<i64: 8, 1>}]} {
    %c0_i32 = arith.constant 0 : i32
    %0 = arith.cmpi eq, %arg1, %c0_i32 : i32
    %1 = arith.extui %0 : i1 to i32
    %c0_i32_0 = arith.constant 0 : i32
    %2 = arith.cmpi ne, %1, %c0_i32_0 : i32
    scf.if %2 {
      %cst_28 = arith.constant 0xFF800000 : f32
      %45 = vector.broadcast %cst_28 : f32 to vector<8x1xf32>
      %c0_29 = arith.constant 0 : index
      %c0_30 = arith.constant 0 : index
      %46 = vector.load %arg5[%c0_29, %c0_30] : memref<8x1xf32, #tpu.memory_space<vmem>>, vector<8x1xf32>
      tpu.vector_store %arg5[%c0_29, %c0_30], %45 {strides = array<i32>} : memref<8x1xf32, #tpu.memory_space<vmem>>, vector<8x1xf32>,
      %cst_31 = arith.constant 0.000000e+00 : f32
      %47 = vector.broadcast %cst_31 : f32 to vector<8x1xf32>
      %c0_32 = arith.constant 0 : index
      %c0_33 = arith.constant 0 : index
      %48 = vector.load %arg6[%c0_32, %c0_33] : memref<8x1xf32, #tpu.memory_space<vmem>>, vector<8x1xf32>
      tpu.vector_store %arg6[%c0_32, %c0_33], %47 {strides = array<i32>} : memref<8x1xf32, #tpu.memory_space<vmem>>, vector<8x1xf32>,
      %cst_34 = arith.constant 0.000000e+00 : f32
      %49 = vector.broadcast %cst_34 : f32 to vector<8x1xf32>
      %c0_35 = arith.constant 0 : index
      %c0_36 = arith.constant 0 : index
      %50 = vector.load %arg7[%c0_35, %c0_36] : memref<8x1xf32, #tpu.memory_space<vmem>>, vector<8x1xf32>
      tpu.vector_store %arg7[%c0_35, %c0_36], %49 {strides = array<i32>} : memref<8x1xf32, #tpu.memory_space<vmem>>, vector<8x1xf32>,
      %cst_37 = arith.constant 0.000000e+00 : f32
      %51 = vector.broadcast %cst_37 : f32 to vector<8x1xf32>
      %c0_38 = arith.constant 0 : index
      %c0_39 = arith.constant 0 : index
      %52 = vector.load %arg8[%c0_38, %c0_39] : memref<8x1xf32, #tpu.memory_space<vmem>>, vector<8x1xf32>
      tpu.vector_store %arg8[%c0_38, %c0_39], %51 {strides = array<i32>} : memref<8x1xf32, #tpu.memory_space<vmem>>, vector<8x1xf32>,
    } else {
    }
    %c0 = arith.constant 0 : index
    %c0_1 = arith.constant 0 : index
    %3 = vector.load %arg2[%c0, %c0_1] : memref<8x16xf32, #tpu.memory_space<vmem>>, vector<8x16xf32>
    %4 = tpu.iota {dimensions = array<i32: 1>} : vector<1x16xi32>
    %c16_i32 = arith.constant 16 : i32
    %5 = arith.muli %arg1, %c16_i32 : i32
    %6 = vector.broadcast %5 : i32 to vector<1x16xi32>
    %7 = arith.addi %4, %6 : vector<1x16xi32>
    %cst = arith.constant dense<0xFF800000> : vector<8xf32>
    %8 = vector.multi_reduction <maximumf>, %3, %cst [1] : vector<8x16xf32> to vector<8xf32>
    %9 = vector.shape_cast %8 : vector<8xf32> to vector<8x1xf32>
    %c0_2 = arith.constant 0 : index
    %c0_3 = arith.constant 0 : index
    %10 = vector.load %arg5[%c0_2, %c0_3] : memref<8x1xf32, #tpu.memory_space<vmem>>, vector<8x1xf32>
    %11 = arith.maximumf %10, %9 : vector<8x1xf32>
    %c0_4 = arith.constant 0 : index
    %c0_5 = arith.constant 0 : index
    %12 = vector.load %arg6[%c0_4, %c0_5] : memref<8x1xf32, #tpu.memory_space<vmem>>, vector<8x1xf32>
    %c0_6 = arith.constant 0 : index
    %c0_7 = arith.constant 0 : index
    %13 = vector.load %arg5[%c0_6, %c0_7] : memref<8x1xf32, #tpu.memory_space<vmem>>, vector<8x1xf32>
    %14 = arith.subf %13, %11 : vector<8x1xf32>
    %15 = math.exp %14 : vector<8x1xf32>
    %16 = arith.mulf %12, %15 : vector<8x1xf32>
    %17 = vector.broadcast %11 : vector<8x1xf32> to vector<8x16xf32>
    %18 = arith.subf %3, %17 : vector<8x16xf32>
    %19 = math.exp %18 : vector<8x16xf32>
    %cst_8 = arith.constant dense<0.000000e+00> : vector<8xf32>
    %20 = vector.multi_reduction <add>, %19, %cst_8 [1] : vector<8x16xf32> to vector<8xf32>
    %21 = vector.shape_cast %20 : vector<8xf32> to vector<8x1xf32>
    %22 = arith.addf %16, %21 : vector<8x1xf32>
    %c0_9 = arith.constant 0 : index
    %c0_10 = arith.constant 0 : index
    %23 = vector.load %arg6[%c0_9, %c0_10] : memref<8x1xf32, #tpu.memory_space<vmem>>, vector<8x1xf32>
    tpu.vector_store %arg6[%c0_9, %c0_10], %22 {strides = array<i32>} : memref<8x1xf32, #tpu.memory_space<vmem>>, vector<8x1xf32>,
    %c0_11 = arith.constant 0 : index
    %c0_12 = arith.constant 0 : index
    %24 = vector.load %arg5[%c0_11, %c0_12] : memref<8x1xf32, #tpu.memory_space<vmem>>, vector<8x1xf32>
    tpu.vector_store %arg5[%c0_11, %c0_12], %11 {strides = array<i32>} : memref<8x1xf32, #tpu.memory_space<vmem>>, vector<8x1xf32>,
    %c0_13 = arith.constant 0 : index
    %c0_14 = arith.constant 0 : index
    %25 = vector.load %arg7[%c0_13, %c0_14] : memref<8x1xf32, #tpu.memory_space<vmem>>, vector<8x1xf32>
    %cst_15 = arith.constant dense<0.000000e+00> : vector<8xf32>
    %26 = vector.multi_reduction <add>, %3, %cst_15 [1] : vector<8x16xf32> to vector<8xf32>
    %27 = vector.shape_cast %26 : vector<8xf32> to vector<8x1xf32>
    %28 = arith.addf %25, %27 : vector<8x1xf32>
    %c0_16 = arith.constant 0 : index
    %c0_17 = arith.constant 0 : index
    %29 = vector.load %arg7[%c0_16, %c0_17] : memref<8x1xf32, #tpu.memory_space<vmem>>, vector<8x1xf32>
    tpu.vector_store %arg7[%c0_16, %c0_17], %28 {strides = array<i32>} : memref<8x1xf32, #tpu.memory_space<vmem>>, vector<8x1xf32>,
    %c0_18 = arith.constant 0 : index
    %c0_19 = arith.constant 0 : index
    %30 = vector.load %arg3[%c0_18, %c0_19] : memref<8x1xi32, #tpu.memory_space<vmem>>, vector<8x1xi32>
    %c0_20 = arith.constant 0 : index
    %c0_21 = arith.constant 0 : index
    %31 = vector.load %arg8[%c0_20, %c0_21] : memref<8x1xf32, #tpu.memory_space<vmem>>, vector<8x1xf32>
    %32 = vector.broadcast %7 : vector<1x16xi32> to vector<8x16xi32>
    %33 = vector.broadcast %30 : vector<8x1xi32> to vector<8x16xi32>
    %34 = arith.cmpi eq, %32, %33 : vector<8x16xi32>
    %c0_i32_22 = arith.constant 0 : i32
    %35 = arith.sitofp %c0_i32_22 : i32 to f32
    %36 = vector.broadcast %35 : f32 to vector<8x16xf32>
    %37 = arith.select %34, %3, %36 : vector<8x16xi1>, vector<8x16xf32>
    %cst_23 = arith.constant dense<0.000000e+00> : vector<8xf32>
    %38 = vector.multi_reduction <add>, %37, %cst_23 [1] : vector<8x16xf32> to vector<8xf32>
    %39 = vector.shape_cast %38 : vector<8xf32> to vector<8x1xf32>
    %40 = arith.addf %31, %39 : vector<8x1xf32>
    %c0_24 = arith.constant 0 : index
    %c0_25 = arith.constant 0 : index
    %41 = vector.load %arg8[%c0_24, %c0_25] : memref<8x1xf32, #tpu.memory_space<vmem>>, vector<8x1xf32>
    tpu.vector_store %arg8[%c0_24, %c0_25], %40 {strides = array<i32>} : memref<8x1xf32, #tpu.memory_space<vmem>>, vector<8x1xf32>,
    %c0_i32_26 = arith.constant 0 : i32
    %42 = arith.cmpi eq, %arg1, %c0_i32_26 : i32
    %43 = arith.extui %42 : i1 to i32
    %c0_i32_27 = arith.constant 0 : i32
    %44 = arith.cmpi ne, %43, %c0_i32_27 : i32
    scf.if %44 {
      %c0_28 = arith.constant 0 : index
      %c0_29 = arith.constant 0 : index
      %45 = vector.load %arg5[%c0_28, %c0_29] : memref<8x1xf32, #tpu.memory_space<vmem>>, vector<8x1xf32>
      %c0_30 = arith.constant 0 : index
      %c0_31 = arith.constant 0 : index
      %46 = vector.load %arg6[%c0_30, %c0_31] : memref<8x1xf32, #tpu.memory_space<vmem>>, vector<8x1xf32>
      %47 = math.log %46 : vector<8x1xf32>
      %48 = arith.addf %45, %47 : vector<8x1xf32>
      %c0_32 = arith.constant 0 : index
      %c0_33 = arith.constant 0 : index
      %49 = vector.load %arg8[%c0_32, %c0_33] : memref<8x1xf32, #tpu.memory_space<vmem>>, vector<8x1xf32>
      %50 = arith.subf %48, %49 : vector<8x1xf32>
      %c0_34 = arith.constant 0 : index
      %c0_35 = arith.constant 0 : index
      %51 = vector.load %arg7[%c0_34, %c0_35] : memref<8x1xf32, #tpu.memory_space<vmem>>, vector<8x1xf32>
      %cst_36 = arith.constant 6.250000e-02 : f32
      %52 = vector.broadcast %cst_36 : f32 to vector<8x1xf32>
      %53 = arith.mulf %51, %52 : vector<8x1xf32>
      %54 = arith.subf %48, %53 : vector<8x1xf32>
      %cst_37 = arith.constant 0.899999976 : f32
      %55 = vector.broadcast %cst_37 : f32 to vector<8x1xf32>
      %56 = arith.mulf %55, %50 : vector<8x1xf32>
      %cst_38 = arith.constant 1.000000e-01 : f32
      %57 = vector.broadcast %cst_38 : f32 to vector<8x1xf32>
      %58 = arith.mulf %57, %54 : vector<8x1xf32>
      %59 = arith.addf %56, %58 : vector<8x1xf32>
      %c0_39 = arith.constant 0 : index
      %c0_40 = arith.constant 0 : index
      %60 = vector.load %arg4[%c0_39, %c0_40] : memref<8x1xf32, #tpu.memory_space<vmem>>, vector<8x1xf32>
      tpu.vector_store %arg4[%c0_39, %c0_40], %59 {strides = array<i32>} : memref<8x1xf32, #tpu.memory_space<vmem>>, vector<8x1xf32>,
    } else {
    }
    return
  }
  func.func @transform_0(%arg0: i32, %arg1: i32) -> (i32, i32) {
    %c0_i32 = arith.constant 0 : i32
    return %arg0, %arg1 : i32, i32
  }
  func.func @transform_1(%arg0: i32, %arg1: i32) -> (i32, i32) {
    %c0_i32 = arith.constant 0 : i32
    %c0_i32_0 = arith.constant 0 : i32
    return %arg0, %c0_i32 : i32, i32
  }
  func.func @transform_2(%arg0: i32, %arg1: i32) -> (i32, i32) {
    %c0_i32 = arith.constant 0 : i32
    %c0_i32_0 = arith.constant 0 : i32
    return %arg0, %c0_i32 : i32, i32
  }
}

</mosaic_0001>

<bundles_post_ra>
// kernel: tpu_custom_call.1
= control target key start
LH: loop header
LB: loop body
LE: loop exit
PB: predicated region body
PF: predicated region fallthrough
CT: control target
= control target key end

     0   :  { %vm26_vm0 = vcmask 130048   ;;  %vm15_vm1 = vcmask 7168   ;;  %v102_v1 = vmov -inf   ;;  %v103_v3 = vmov 0   ;;  %s142_s0 = inlined_call_operand.vmem [shape: f32[8,16], index: 0, kind: input, shape index: {}]   ;;  %s143_s1 = inlined_call_operand.vmem [shape: s32[8,1], index: 1, kind: input, shape index: {}]   ;;  %s144_s2 = inlined_call_operand.vmem [shape: f32[8,1], index: 2, kind: output, shape index: {}]  }
   0x1   :  { %v20_v0 = vld [vmem:[%s142_s0] sm:$0xff]  ;;  %16 = vst.msk [vmem:[#allocation2] sm:$0xff] %vm15_vm1, %v102_v1  ;;  %94 = vset.pattern.permute.xlu0 %v103_v3  ;;  %95 = vset.pattern.permute.xlu1 %v103_v3  ;;  %v104_v4 = vmov 0.0   ;;  %v21_v11 = vlaneseq }
   0x2   :  { %v27_v2 = vsel %vm26_vm0, %v20_v0, -inf  ;;  %17 = vst.msk [vmem:[#allocation3] sm:$0xff] %vm15_vm1, %v104_v4  ;;  %v58_v5 = vld [vmem:[%s143_s1] sm:$0xff]  ;;  %v53_v10 = vsel %vm26_vm0, %v20_v0, 0.0 }
   0x3   :  { %28 = vmax.xlane.f32.xlu0 %v27_v2  ;;  %18 = vst.msk [vmem:[#allocation4] sm:$0xff] %vm15_vm1, %v104_v4  ;;  %61 = vperm.xlu1 %95, %v58_v5   ;;  %v22_v13 = vand.u32 127, %v21_v11 }
   0x4   :  { %19 = vst.msk [vmem:[#allocation5] sm:$0xff] %vm15_vm1, %v104_v4  ;;  %54 = vadd.xlane.f32.xlu2 %v53_v10 }
   0x8   :  { %v30_v6 = vld [vmem:[#allocation2] sm:$0xff] }
   0x9   :  { %v32_v29 = vld [vmem:[#allocation3] sm:$0xff] }
   0xa   :  { %v52_v21 = vld [vmem:[#allocation4] sm:$0xff] }
   0xb   :  { %v59_v24 = vld [vmem:[#allocation5] sm:$0xff] }
  0x75   :  { %v62_v12 = vpop.permute.xlu1 %61 }
  0x76   :  { %v29_v7 = vpop.xlane.xlu0 %28  ;;  %vm63_vm2 = vcmp.eq.s32.totalorder %v22_v13, %v62_v12 }
  0x77   :  { %v31_v8 = vmax.f32 %v30_v6, %v29_v7  ;;  %v64_v14 = vsel %vm63_vm2, %v20_v0, 0.0  ;;  %v55_v22 = vpop.xlane.xlu2 %54 }
  0x78   :  { %v65_v15 = vsel %vm26_vm0, %v64_v14, 0.0  ;;  %v56_v23 = vadd.f32 %v55_v22, %v52_v21 }
  0x79   :  { %v33_v9 = vsub.f32 %v30_v6, %v31_v8  ;;  %51 = vst.msk [vmem:[#allocation2] sm:$0xff] %vm15_vm1, %v31_v8  ;;  %39 = vperm.xlu0 %94, %v31_v8   ;;  %66 = vadd.xlane.f32.xlu2 %v65_v15 }
  0x7a   :  { %57 = vst.msk [vmem:[#allocation4] sm:$0xff] %vm15_vm1, %v56_v23 }
  0x7b   :  { %v34_v27 = vmul.f32 1.442695, %v33_v9 }
  0x80   :  { %v73_v37 = vld [vmem:[#allocation2] sm:$0xff] }
  0x81   :  { %v80_v35 = vld [vmem:[#allocation4] sm:$0xff] }
  0x82   :  { %v81_v40 = vmul.f32 0.0625, %v80_v35 }
  0xeb   :  { %v40_v16 = vpop.permute.xlu0 %39 }
  0xec   :  { %v42_v17 = vsub.f32 %v20_v0, %v40_v16  ;;  %v67_v25 = vpop.xlane.xlu2 %66 }
  0xed   :  { %v68_v26 = vadd.f32 %v67_v25, %v59_v24 }
  0xee   :  { %v43_v18 = vmul.f32 1.442695, %v42_v17 }
  0xef   :  { %69 = vst.msk [vmem:[#allocation5] sm:$0xff] %vm15_vm1, %v68_v26 }
  0xf0   :  { %96 = vpow2.f32 %v43_v18 }
  0xf1   :  { %98 = vpow2.f32 %v34_v27 }
  0xf6   :  { %v97_v19 = vpop.eup %96  ;;  %v78_v38 = vld [vmem:[#allocation5] sm:$0xff] }
  0xf7   :  { %v45_v20 = vsel %vm26_vm0, %v97_v19, 0.0  ;;  %v99_v28 = vpop.eup %98 }
  0xf8   :  { %46 = vadd.xlane.f32.xlu1 %v45_v20  ;;  %v36_v30 = vmul.f32 %v99_v28, %v32_v29 }
 0x16b   :  { %v47_v31 = vpop.xlane.xlu1 %46 }
 0x16c   :  { %v48_v32 = vadd.f32 %v47_v31, %v36_v30 }
 0x16e   :  { %50 = vst.msk [vmem:[#allocation3] sm:$0xff] %vm15_vm1, %v48_v32 }
 0x175   :  { %v74_v33 = vld [vmem:[#allocation3] sm:$0xff] }
 0x176   :  { %100 = vlog2.f32 %v74_v33 }
 0x17c   :  { %v101_v34 = vpop.eup %100 }
 0x17d   :  { %v76_v36 = vmul.f32 0.6931472, %v101_v34 }
 0x17f   :  { %v77_v39 = vadd.f32 %v76_v36, %v73_v37 }
 0x181   :  { %v82_v41 = vsub.f32 %v77_v39, %v81_v40  ;;  %v79_v42 = vsub.f32 %v77_v39, %v78_v38 }
 0x183   :  { %v84_v43 = vmul.f32 0.1, %v82_v41  ;;  %v83_v44 = vmul.f32 0.9, %v79_v42 }
 0x185   :  { %v85_v45 = vadd.f32 %v84_v43, %v83_v44 }
 0x187   :  { %86 = vst.msk [vmem:[%s144_s2] sm:$0xff] %vm15_vm1, %v85_v45 }

</bundles_post_ra>
